<compile_context>
chip_gen: v6e
topology: v6e:2x2x1
jax: 0.10.0
libtpu: 0.0.40
codegen_flags: <defaults>
</compile_context>

<pallas_src>
import jax
import jax.numpy as jnp
from jax import lax
from jax.experimental import pallas as pl
from jax.experimental.pallas import tpu as pltpu


def _attn_body(x_ref, w_ref, b_ref, o_ref, seed_ref, *, dropout_p, B, T, FP):
    # x_ref: (B*T, Din)  w_ref: (Din, 3*FP)  b_ref: (1, 3*FP)  o_ref: (B, T, FP)
    # One fused QKV projection on the MXU (bias broadcast over rows).
    qkv = jnp.dot(x_ref[...], w_ref[...],
                  preferred_element_type=jnp.float32) + b_ref[...]   # (B*T, 3*FP)

    if dropout_p > 0.0:
        # F.dropout defaults to training=True in the reference module.
        # TODO(synk): fold pl.program_id / core id into the seed once a grid
        # or a v7x "parallel" axis is introduced.
        pltpu.prng_seed(seed_ref[0])
        thr = min(int(dropout_p * 4294967296.0), 4294967295)
        inv_keep = 1.0 / (1.0 - dropout_p)

    # Static unroll over the (tiny) batch: all-2D matmuls, no reshapes,
    # sublane-aligned row slices (T == 8).
    for b in range(B):
        rows = slice(b * T, (b + 1) * T)
        q = qkv[rows, 0 * FP:1 * FP]          # (T, FP), scale pre-folded
        k = qkv[rows, 1 * FP:2 * FP]
        v = qkv[rows, 2 * FP:3 * FP]

        # q @ k^T without materializing k.T: contract the last dims.
        s = lax.dot_general(q, k,
                            dimension_numbers=(((1,), (1,)), ((), ())),
                            preferred_element_type=jnp.float32)      # (T, T)

        # Numerically stable softmax over the last axis (exact reciprocal).
        m = jnp.max(s, axis=-1, keepdims=True)
        e = jnp.exp(s - m)
        p = e / jnp.sum(e, axis=-1, keepdims=True)

        if dropout_p > 0.0:
            bits = pltpu.bitcast(pltpu.prng_random_bits(p.shape), jnp.uint32)
            p = p * jnp.where(bits >= jnp.uint32(thr),
                              jnp.float32(inv_keep), jnp.float32(0.0))

        out_b = jnp.dot(p, v, preferred_element_type=jnp.float32)    # (T, FP)
        o_ref[b] = out_b.astype(o_ref.dtype)


def attention_forward(x, wq, bq, wk, bk, wv, bv, *, scale_factor,
                      dropout_p=0.0, seed=None):
    B, T, Din = x.shape
    F = wq.shape[1]
    FP = ((F + 127) // 128) * 128     # per-projection lane-aligned width

    # Host-side parameter packing (one-time, zero kernel cost): pad each
    # projection to a full 128-lane tile; fold scale_factor into q's columns.
    pad_w = lambda w: jnp.pad(w, ((0, 0), (0, FP - F)))
    pad_b = lambda v: jnp.pad(v, (0, FP - F))
    w_qkv = jnp.concatenate(
        [pad_w(wq) * scale_factor, pad_w(wk), pad_w(wv)], axis=1)    # (Din, 3*FP)
    b_qkv = jnp.concatenate(
        [pad_b(bq) * scale_factor, pad_b(bk), pad_b(bv)]).reshape(1, 3 * FP)

    x2 = x.reshape(B * T, Din)        # free on contiguous HBM (wrapper-side)

    vmem = pl.BlockSpec(memory_space=pltpu.MemorySpace.VMEM)
    if dropout_p > 0.0:
        if seed is None:
            seed = jnp.zeros((1,), jnp.int32)

        def kernel(seed_ref, x_ref, w_ref, b_ref, o_ref):
            _attn_body(x_ref, w_ref, b_ref, o_ref, seed_ref,
                       dropout_p=float(dropout_p), B=B, T=T, FP=FP)

        in_specs = [pl.BlockSpec(memory_space=pltpu.MemorySpace.SMEM),
                    vmem, vmem, vmem]
        args = (seed, x2, w_qkv, b_qkv)
    else:
        def kernel(x_ref, w_ref, b_ref, o_ref):
            _attn_body(x_ref, w_ref, b_ref, o_ref, None,
                       dropout_p=0.0, B=B, T=T, FP=FP)

        in_specs = [vmem, vmem, vmem]
        args = (x2, w_qkv, b_qkv)

    flops = 2 * (B * T) * Din * (3 * FP) + 4 * B * T * T * FP
    transcendentals = B * T * T
    bytes_accessed = 4 * (B * T * Din + Din * 3 * FP + 3 * FP + B * T * FP) \
        + (4 if dropout_p > 0.0 else 0)

    out_padded = pl.pallas_call(
        kernel,
        out_shape=jax.ShapeDtypeStruct((B, T, FP), jnp.float32),
        in_specs=in_specs,
        out_specs=vmem,
        cost_estimate=pl.CostEstimate(flops=flops,
                                      transcendentals=transcendentals,
                                      bytes_accessed=bytes_accessed),
    )(*args)
    # Lane-dense (B, T, 128) slab was stored in-kernel; trim to ff_dim outside.
    return out_padded[..., :F]


def reference_forward(x, wq, bq, wk, bk, wv, bv, *, scale_factor):
    hp = lax.Precision.HIGHEST
    q = jnp.einsum("btd,df->btf", x, wq, precision=hp) + bq
    k = jnp.einsum("btd,df->btf", x, wk, precision=hp) + bk
    v = jnp.einsum("btd,df->btf", x, wv, precision=hp) + bv
    qk = jnp.einsum("btf,bsf->bts", q, k, precision=hp) * scale_factor
    p = jax.nn.softmax(qk, axis=-1)
    return jnp.einsum("bts,bsf->btf", p, v, precision=hp)


if __name__ == "__main__":
    # Model hyperparameters (small, consistent with the module's forward).
    seq_len = 16        # input feature dim fed to the Linear layers
    ff_dim = 32
    B, T = 2, 8         # batch, number of tokens
    scale_factor = 0.125
    dropout_p = 0.0     # deterministic run (F.dropout with p=0 is identity)

    key = jax.random.PRNGKey(0)
    kx, kq, kqb, kk, kkb, kv, kvb = jax.random.split(key, 7)

    # Deterministic parameter init mimicking nn.Linear (uniform +-1/sqrt(fan_in)).
    bound = 1.0 / (seq_len ** 0.5)
    wq = jax.random.uniform(kq,  (seq_len, ff_dim), jnp.float32, -bound, bound)
    bq = jax.random.uniform(kqb, (ff_dim,),         jnp.float32, -bound, bound)
    wk = jax.random.uniform(kk,  (seq_len, ff_dim), jnp.float32, -bound, bound)
    bk = jax.random.uniform(kkb, (ff_dim,),         jnp.float32, -bound, bound)
    wv = jax.random.uniform(kv,  (seq_len, ff_dim), jnp.float32, -bound, bound)
    bv = jax.random.uniform(kvb, (ff_dim,),         jnp.float32, -bound, bound)

    x = jax.random.normal(kx, (B, T, seq_len), jnp.float32)

    out = attention_forward(x, wq, bq, wk, bk, wv, bv,
                            scale_factor=scale_factor, dropout_p=dropout_p)
    out = jax.block_until_ready(out)

    ref = reference_forward(x, wq, bq, wk, bk, wv, bv,
                            scale_factor=scale_factor)
    assert out.shape == (B, T, ff_dim)
    assert jnp.allclose(out, ref, atol=1e-3, rtol=1e-3)

    print("KERNEL_OK")
</pallas_src>

<mosaic_0001>
module attributes {stable_mosaic.version = 11 : i64} {
  func.func @kernel(%arg0: memref<16x16xf32, #tpu.memory_space<vmem>>, %arg1: memref<16x384xf32, #tpu.memory_space<vmem>>, %arg2: memref<1x384xf32, #tpu.memory_space<vmem>>, %arg3: memref<2x8x128xf32, #tpu.memory_space<vmem>>) attributes {dimension_semantics = [], scalar_prefetch = 0 : i64, scratch_operands = 0 : i64, tpu.core_type = #tpu.core_type<tc>} {
    %c0 = arith.constant 0 : index
    %c0_0 = arith.constant 0 : index
    %0 = vector.load %arg0[%c0, %c0_0] : memref<16x16xf32, #tpu.memory_space<vmem>>, vector<16x16xf32>
    %c0_1 = arith.constant 0 : index
    %c0_2 = arith.constant 0 : index
    %1 = vector.load %arg1[%c0_1, %c0_2] : memref<16x384xf32, #tpu.memory_space<vmem>>, vector<16x384xf32>
    %cst = arith.constant dense<0.000000e+00> : vector<16x384xf32>
    %2 = tpu.matmul %0, %1, %cst {dimension_numbers = #tpu.dot_dimension_numbers<[1], [0], [0], [1], [0, 0, 1, 1], [], []>} : vector<16x16xf32>, vector<16x384xf32>, vector<16x384xf32> -> vector<16x384xf32>
    %c0_3 = arith.constant 0 : index
    %c0_4 = arith.constant 0 : index
    %3 = vector.load %arg2[%c0_3, %c0_4] : memref<1x384xf32, #tpu.memory_space<vmem>>, vector<1x384xf32>
    %4 = vector.broadcast %3 : vector<1x384xf32> to vector<16x384xf32>
    %5 = arith.addf %2, %4 : vector<16x384xf32>
    %6 = vector.extract_strided_slice %5 {offsets = [0, 0], sizes = [8, 128], strides = [1, 1]} : vector<16x384xf32> to vector<8x128xf32>
    %7 = vector.extract_strided_slice %5 {offsets = [0, 128], sizes = [8, 128], strides = [1, 1]} : vector<16x384xf32> to vector<8x128xf32>
    %8 = vector.extract_strided_slice %5 {offsets = [0, 256], sizes = [8, 128], strides = [1, 1]} : vector<16x384xf32> to vector<8x128xf32>
    %cst_5 = arith.constant dense<0.000000e+00> : vector<8x8xf32>
    %9 = tpu.matmul %6, %7, %cst_5 {dimension_numbers = #tpu.dot_dimension_numbers<[1], [1], [0], [0], [0, 0, 1, 0], [], []>} : vector<8x128xf32>, vector<8x128xf32>, vector<8x8xf32> -> vector<8x8xf32>
    %cst_6 = arith.constant dense<0xFF800000> : vector<8xf32>
    %10 = vector.multi_reduction <maximumf>, %9, %cst_6 [1] : vector<8x8xf32> to vector<8xf32>
    %11 = vector.shape_cast %10 : vector<8xf32> to vector<8x1xf32>
    %12 = vector.broadcast %11 : vector<8x1xf32> to vector<8x8xf32>
    %13 = arith.subf %9, %12 : vector<8x8xf32>
    %14 = math.exp %13 : vector<8x8xf32>
    %cst_7 = arith.constant dense<0.000000e+00> : vector<8xf32>
    %15 = vector.multi_reduction <add>, %14, %cst_7 [1] : vector<8x8xf32> to vector<8xf32>
    %16 = vector.shape_cast %15 : vector<8xf32> to vector<8x1xf32>
    %17 = vector.broadcast %16 : vector<8x1xf32> to vector<8x8xf32>
    %18 = arith.divf %14, %17 : vector<8x8xf32>
    %cst_8 = arith.constant dense<0.000000e+00> : vector<8x128xf32>
    %19 = tpu.matmul %18, %8, %cst_8 {dimension_numbers = #tpu.dot_dimension_numbers<[1], [0], [0], [1], [0, 0, 1, 1], [], []>} : vector<8x8xf32>, vector<8x128xf32>, vector<8x128xf32> -> vector<8x128xf32>
    %c0_9 = arith.constant 0 : index
    %c0_10 = arith.constant 0 : index
    %c0_11 = arith.constant 0 : index
    %20 = vector.load %arg3[%c0_9, %c0_10, %c0_11] : memref<2x8x128xf32, #tpu.memory_space<vmem>>, vector<1x8x128xf32>
    %21 = vector.shape_cast %20 : vector<1x8x128xf32> to vector<8x128xf32>
    %22 = vector.shape_cast %19 : vector<8x128xf32> to vector<1x8x128xf32>
    tpu.vector_store %arg3[%c0_9, %c0_10, %c0_11], %22 {strides = array<i32>} : memref<2x8x128xf32, #tpu.memory_space<vmem>>, vector<1x8x128xf32>,
    %23 = vector.extract_strided_slice %5 {offsets = [8, 0], sizes = [8, 128], strides = [1, 1]} : vector<16x384xf32> to vector<8x128xf32>
    %24 = vector.extract_strided_slice %5 {offsets = [8, 128], sizes = [8, 128], strides = [1, 1]} : vector<16x384xf32> to vector<8x128xf32>
    %25 = vector.extract_strided_slice %5 {offsets = [8, 256], sizes = [8, 128], strides = [1, 1]} : vector<16x384xf32> to vector<8x128xf32>
    %cst_12 = arith.constant dense<0.000000e+00> : vector<8x8xf32>
    %26 = tpu.matmul %23, %24, %cst_12 {dimension_numbers = #tpu.dot_dimension_numbers<[1], [1], [0], [0], [0, 0, 1, 0], [], []>} : vector<8x128xf32>, vector<8x128xf32>, vector<8x8xf32> -> vector<8x8xf32>
    %cst_13 = arith.constant dense<0xFF800000> : vector<8xf32>
    %27 = vector.multi_reduction <maximumf>, %26, %cst_13 [1] : vector<8x8xf32> to vector<8xf32>
    %28 = vector.shape_cast %27 : vector<8xf32> to vector<8x1xf32>
    %29 = vector.broadcast %28 : vector<8x1xf32> to vector<8x8xf32>
    %30 = arith.subf %26, %29 : vector<8x8xf32>
    %31 = math.exp %30 : vector<8x8xf32>
    %cst_14 = arith.constant dense<0.000000e+00> : vector<8xf32>
    %32 = vector.multi_reduction <add>, %31, %cst_14 [1] : vector<8x8xf32> to vector<8xf32>
    %33 = vector.shape_cast %32 : vector<8xf32> to vector<8x1xf32>
    %34 = vector.broadcast %33 : vector<8x1xf32> to vector<8x8xf32>
    %35 = arith.divf %31, %34 : vector<8x8xf32>
    %cst_15 = arith.constant dense<0.000000e+00> : vector<8x128xf32>
    %36 = tpu.matmul %35, %25, %cst_15 {dimension_numbers = #tpu.dot_dimension_numbers<[1], [0], [0], [1], [0, 0, 1, 1], [], []>} : vector<8x8xf32>, vector<8x128xf32>, vector<8x128xf32> -> vector<8x128xf32>
    %c1 = arith.constant 1 : index
    %c0_16 = arith.constant 0 : index
    %c0_17 = arith.constant 0 : index
    %37 = vector.load %arg3[%c1, %c0_16, %c0_17] : memref<2x8x128xf32, #tpu.memory_space<vmem>>, vector<1x8x128xf32>
    %38 = vector.shape_cast %37 : vector<1x8x128xf32> to vector<8x128xf32>
    %39 = vector.shape_cast %36 : vector<8x128xf32> to vector<1x8x128xf32>
    tpu.vector_store %arg3[%c1, %c0_16, %c0_17], %39 {strides = array<i32>} : memref<2x8x128xf32, #tpu.memory_space<vmem>>, vector<1x8x128xf32>,
    return
  }
}

</mosaic_0001>

<bundles_post_ra>
// kernel: tpu_custom_call.1
= control target key start
LH: loop header
LB: loop body
LE: loop exit
PB: predicated region body
PF: predicated region fallthrough
CT: control target
= control target key end

     0   :  { %8 = vsyncpa [#allocation3], 0  ;;  %s756_s0 = inlined_call_operand.hbm [shape: f32[16,16], index: 0, kind: input, shape index: {}]   ;;  %s757_s1 = inlined_call_operand.hbm [shape: f32[16,384], index: 1, kind: input, shape index: {}]   ;;  %s758_s2 = inlined_call_operand.vmem [shape: f32[1,384], index: 2, kind: input, shape index: {}]   ;;  %s759_s3 = inlined_call_operand.hbm [shape: f32[2,8,128], index: 3, kind: output, shape index: {}]  }
   0x1   :  { %9 = vsyncpa [#allocation6], 0 }
   0x2   :  { %10 = vsyncpa [#allocation4], 0  ;;  %s685_s12 = smov [#allocation2]  }
   0x3   :  { %s16_s13 = sshll.u32 %s685_s12, 4  ;;  %s17_s13 = int_to_ptr.vmem [resolvable:$true] %s16_s13 }
   0x4   :  { %s627_s14 = scalar_lea.vmem %s17_s13, 256  ;;  %p632_p1 = scmp.lt.s32.totalorder %s17_s13, %s17_s13 }
   0x5   :  { %p628_p0 = scmp.ne.s32.totalorder %s17_s13, %s627_s14  ;;  %p633_p2 = scmp.lt.s32.totalorder %s627_s14, %s627_s14 }
   0x7   :  { %p634_p3 = por %p633_p2, %p632_p1 }
   0x9   :  { %p635_p4 = pnand %p634_p3, %p628_p0 }
   0xb   :  { %638 = shalt.err (!%p635_p4)
}
   0xc   :  { %s686_s15 = smov 128   ;;  %s687_s16 = smov 8  }
   0xd   :  { %22 = dma.hbm_to_vmem [thread:$0]  %s756_s0, 256, %s17_s13, [#allocation3], %s686_s15, %s686_s15, %s687_s16  }
   0xe   :  { %s688_s19 = smov [#allocation5]  }
   0xf   :  { %s28_s20 = sshll.u32 %s688_s19, 4  ;;  %s29_s20 = int_to_ptr.vmem [resolvable:$true] %s28_s20 }
  0x10   :  { %s647_s21 = scalar_lea.vmem %s29_s20, 768  ;;  %p652_p6 = scmp.lt.s32.totalorder %s29_s20, %s29_s20 }
  0x11   :  { %p648_p5 = scmp.ne.s32.totalorder %s29_s20, %s647_s21  ;;  %p653_p7 = scmp.lt.s32.totalorder %s647_s21, %s647_s21 }
  0x13   :  { %p654_p8 = por %p653_p7, %p652_p6 }
  0x15   :  { %p655_p9 = pnand %p654_p8, %p648_p5 }
  0x17   :  { %658 = shalt.err (!%p655_p9)
}
  0x18   :  { %s689_s22 = smov 384   ;;  %s690_s23 = smov 24  }
  0x19   :  { %34 = dma.hbm_to_vmem [thread:$0]  %s757_s1, 768, %s29_s20, [#allocation6], %s689_s22, %s689_s22, %s690_s23  }
  0x1a   :  { %679 = dma.done.wait [#allocation3], 256  }
  0x1b   :  { %680 = vsyncadd [#allocation3], 4294967040 }
  0x1c   :  { %681 = dma.done.wait [#allocation6], 768  }
  0x1d   :  { %682 = vsyncadd [#allocation6], 4294966528  ;;  %v691_v0 = vmov 0.0   ;;  %v49_v1 = vld [vmem:[#allocation5 + $0x20] sm:$0xff]  ;;  %v48_v2 = vld [vmem:[#allocation5 + $0x18] sm:$0xff]  ;;  %vm68_vm0 = vcmask 130048   ;;  %v53_v9 = vlaneseq }
  0x1e   :  { %139 = vmatprep.mubr.f32.mxu0 %v691_v0  ;;  %v46_v3 = vld [vmem:[#allocation5 + $0x8] sm:$0xff]  ;;  %103 = vmatprep.subr.mxu0 %v49_v1  ;;  %v45_v4 = vld [vmem:[#allocation5] sm:$0xff]  ;;  %v43_v5 = vld [vmem:[#allocation2] sm:$0xff]  ;;  %vm692_vm1 = vmmov 0   ;;  %vm297_vm2 = vcmask 64512  }
  0x1f   :  { %104 = vmatpush1.msra.mxu0 %v48_v2  ;;  %v50_v6 = vld [vmem:[#allocation5 + $0x28] sm:$0xff]  ;;  %579 = vmatprep.mubr.msk.f32.mxu1 %vm68_vm0, %v43_v5  ;;  %v44_v7 = vld [vmem:[#allocation2 + $0x8] sm:$0xff]  ;;  %v47_v8 = vld [vmem:[#allocation5 + $0x10] sm:$0xff]  ;;  %v54_v10 = vshrl.u32 %v53_v9, 7 }
  0x20   :  { %105 = vmatprep.subr.mxu0 %v46_v3  ;;  %575 = vmatprep.subr.mxu1 %v50_v6  ;;  %v51_v12 = vld [vmem:[%s758_s2] sm:$0x7]  ;;  %s693_s2 = smov [#allocation7]  }
  0x21   :  { %106 = vmatpush1.msra.mxu0 %v45_v4  ;;  %576 = vmatpush3.msra.mxu1 %v50_v6  ;;  %v59_v11 = vsub.s32 1, %v54_v10  ;;  %v55_v13 = vsub.s32 0, %v54_v10  ;;  %v63_v24 = vsub.s32 2, %v54_v10  ;;  %s544_s26 = sshll.u32 %s693_s2, 4  ;;  %s545_s26 = int_to_ptr.vmem [resolvable:$true] %s544_s26 }
  0x22   :  { %557 = vmatmul.mubr.msk.f32.vlgmr.msra.gmra.mxu0 %vm68_vm0, %v43_v5  ;;  %587 = vmatprep.subr.mxu0 %v691_v0  ;;  %s659_s27 = scalar_lea.vmem %s545_s26, 256  ;;  %p664_p11 = scmp.lt.s32.totalorder %s545_s26, %s545_s26 }
  0x23   :  { %145 = vmatprep.mubr.f32.mxu0 %v691_v0  ;;  %577 = vmatprep.subr.mxu1 %v47_v8  ;;  %v60_v14 = vrot.slane %v51_v12, %v59_v11  ;;  %v56_v16 = vrot.slane %v51_v12, %v55_v13  ;;  %v64_v25 = vrot.slane %v51_v12, %v63_v24  ;;  %p660_p10 = scmp.ne.s32.totalorder %s545_s26, %s659_s27  ;;  %p665_p12 = scmp.lt.s32.totalorder %s659_s27, %s659_s27 }
  0x24   :  { %578 = vmatpush3.msra.mxu1 %v47_v8 }
  0x25   :  { %580 = vmatmul.mubr.msk.f32.vlgmr.msra.gmra.mxu1 %vm68_vm0, %v44_v7  ;;  %582 = vmatprep.subr.mxu1 %v691_v0  ;;  %p666_p13 = por %p665_p12, %p664_p11 }
  0x26   :  { %558 = vmatmul.mubr.msk.f32.gmra.mxu0 %vm68_vm0, %v44_v7  ;;  %584 = vmatprep.mubr.msk.f32.mxu1 %vm692_vm1, %v691_v0 }
  0x27   :  { %589 = vmatprep.mubr.msk.f32.mxu0 %vm692_vm1, %v691_v0  ;;  %p667_p0 = pnand %p666_p13, %p660_p10 }
  0xe2   :  { %v141_v15 = vpop.f32.mrf.mxu0 }
  0xe3   :  { %v142_v20 = vadd.f32 %v141_v15, %v56_v16 }
  0xe4   :  { %v143_v17 = vpop.f32.mrf.mxu0 }
  0xe5   :  { %v144_v18 = vadd.f32 %v143_v17, %v60_v14  ;;  %v581_v26 = vpop.f32.mrf.mxu1 }
  0xe6   :  { %v147_v19 = vpop.f32.mrf.mxu0  ;;  %v224_v27 = vadd.f32 %v581_v26, %v64_v25 }
  0xe7   :  { %583 = vmatpush3.xpose.msra.mxu1 %v144_v18  ;;  %v148_v23 = vadd.f32 %v147_v19, %v56_v16  ;;  %v218_v28 = vpop.f32.mrf.mxu1 }
  0xe8   :  { %v149_v21 = vpop.f32.mrf.mxu0  ;;  %592 = vmatprep.subr.mxu1 %v691_v0  ;;  %v219_v29 = vadd.f32 %v218_v28, %v64_v25 }
  0xe9   :  { %v150_v22 = vadd.f32 %v149_v21, %v60_v14 }
  0xea   :  { %585 = vmatmul.mubr.f32.vlgmr.msra.gmra.mxu1 %v142_v20  ;;  %588 = vmatpush3.msra.mxu0 %v219_v29 }
  0xeb   :  { %593 = vmatpush3.xpose.msra.mxu1 %v150_v22  ;;  %594 = vmatprep.mubr.msk.f32.mxu1 %vm692_vm1, %v691_v0 }
  0xec   :  { %597 = vmatprep.subr.mxu0 %v691_v0 }
  0xee   :  { %595 = vmatmul.mubr.f32.vlgmr.msra.gmra.mxu1 %v148_v23 }
 0x1aa   :  { %v293_v30 = vpop.f32.mrf.mxu1 }
 0x1ab   :  { %v298_v31 = vsel %vm297_vm2, %v293_v30, -inf }
 0x1ac   :  { %299 = vmax.xlane.f32.xlu0 %v298_v31  ;;  %v586_v32 = vpop.f32.mrf.mxu1 }
 0x1ae   :  { %v449_v33 = vpop.f32.mrf.mxu1 }
 0x1af   :  { %v453_v34 = vsel %vm297_vm2, %v449_v33, -inf }
 0x1b0   :  { %454 = vmax.xlane.f32.xlu0 %v453_v34  ;;  %v596_v35 = vpop.f32.mrf.mxu1 }
 0x235   :  { %v300_v36 = vpop.xlane.xlu0 %299 }
 0x236   :  { %v301_v37 = vsub.f32 %v293_v30, %v300_v36 }
 0x238   :  { %v302_v38 = vmul.f32 1.442695, %v301_v37 }
 0x239   :  { %v455_v39 = vpop.xlane.xlu0 %454 }
 0x23a   :  { %611 = vpow2.f32 %v302_v38  ;;  %v456_v40 = vsub.f32 %v449_v33, %v455_v39 }
 0x23c   :  { %v457_v41 = vmul.f32 1.442695, %v456_v40 }
 0x23e   :  { %613 = vpow2.f32 %v457_v41 }
 0x247   :  { %v612_v42 = vpop.eup %611 }
 0x248   :  { %v304_v43 = vsel %vm297_vm2, %v612_v42, 0.0 }
 0x249   :  { %305 = vadd.xlane.f32.xlu1 %v304_v43 }
 0x24b   :  { %v614_v44 = vpop.eup %613 }
 0x24c   :  { %v459_v45 = vsel %vm297_vm2, %v614_v44, 0.0 }
 0x24d   :  { %460 = vadd.xlane.f32.xlu1 %v459_v45 }
 0x2d2   :  { %v306_v46 = vpop.xlane.xlu1 %305 }
 0x2d3   :  { %615 = vrcp.f32 %v306_v46 }
 0x2d6   :  { %v461_v47 = vpop.xlane.xlu1 %460 }
 0x2d7   :  { %617 = vrcp.f32 %v461_v47 }
 0x2e0   :  { %v616_v48 = vpop.eup %615 }
 0x2e1   :  { %v308_v49 = vmul.f32 %v616_v48, %v612_v42 }
 0x2e3   :  { %590 = vmatmul.mubr.msk.f32.vlgmr.msra.gmra.mxu0 %vm297_vm2, %v308_v49 }
 0x2e4   :  { %v618_v50 = vpop.eup %617  ;;  %598 = vmatpush3.msra.mxu0 %v224_v27  ;;  %599 = vmatprep.mubr.msk.f32.mxu0 %vm692_vm1, %v691_v0 }
 0x2e5   :  { %v463_v51 = vmul.f32 %v618_v50, %v614_v44 }
 0x2e7   :  { %600 = vmatmul.mubr.msk.f32.vlgmr.msra.gmra.mxu0 %vm297_vm2, %v463_v51 }
 0x3a3   :  { %v378_v52 = vpop.f32.mrf.mxu0 }
 0x3a4   :  { %382 = vst [vmem:[#allocation7] sm:$0xff] %v378_v52 }
 0x3a5   :  { %v591_v53 = vpop.f32.mrf.mxu0 }
 0x3a7   :  { %v533_v54 = vpop.f32.mrf.mxu0 }
 0x3a8   :  { %538 = vst [vmem:[#allocation7 + $0x8] sm:$0xff] %v533_v54 }
 0x3a9   :  { %v601_v55 = vpop.f32.mrf.mxu0 }
 0x3aa   :  { %670 = shalt.err (!%p667_p0)
}
 0x3ab   :  { %550 = dma.vmem_to_hbm [thread:$0]  %s545_s26, 256, %s759_s3, [#allocation4], %s686_s15, %s686_s15, %s687_s16  }
 0x3ac   :  { %683 = dma.done.wait [#allocation4], 256  }
 0x3ad   :  { %684 = vsyncadd [#allocation4], 4294967040 }
 0x3ae   :  { %554 = vsyncpa [#allocation3], 1 }
 0x3af   :  { %555 = vsyncpa [#allocation6], 1 }
 0x3b0   :  { %556 = vsyncpa [#allocation4], 1 }

</bundles_post_ra>
